<compile_context>
chip_gen: v7x
topology: tpu7x:2x2x1
jax: 0.10.0
libtpu: 0.0.40
codegen_flags: <defaults>
</compile_context>

<pallas_src>
import functools

import jax
import jax.numpy as jnp
from jax.experimental import pallas as pl
from jax.experimental.pallas import tpu as pltpu


def _layernorm_kernel(alpha_ref, beta_ref, x_ref, o_ref, *, eps):
    # x_ref block: (tm, H) — reduce along the last (lane) axis.
    x = x_ref[...].astype(jnp.float32)
    n = x.shape[-1]
    mu = jnp.mean(x, axis=-1, keepdims=True)                    # (tm, 1)
    d = x - mu
    # Unbiased variance (torch.std default: correction = 1). Two-pass
    # centered form for numerical safety.
    var = jnp.sum(d * d, axis=-1, keepdims=True) * jnp.float32(1.0 / (n - 1))
    std = jnp.sqrt(var)
    # Exact reciprocal (approx=False) to stay within 1e-5 of the reference;
    # fold alpha in so the (tm, H)-wide work is one fused multiply-add.
    inv = pl.reciprocal(std + jnp.float32(eps), approx=False)   # (tm, 1)
    a = alpha_ref[0]
    b = beta_ref[0]
    scale = a * inv                                             # (tm, 1)
    o_ref[...] = (d * scale + b).astype(o_ref.dtype)


def _choose_tm(M, H, itemsize):
    """Pick a row-tile size: big enough for HBM roofline, small enough for VMEM."""
    sub = {4: 8, 2: 16, 1: 32}.get(itemsize, 8)   # sublane packing per dtype
    budget = 32 * 1024 * 1024                     # in+out double-buffered target
    per_row = 4 * H * itemsize                    # 2 in bufs + 2 out bufs per row
    tm = 1024
    while tm > sub and tm * per_row > budget:
        tm //= 2
    # Don't exceed the (sublane-padded) number of rows.
    m_pad = -(-M // sub) * sub
    while tm > sub and tm > m_pad:
        tm //= 2
    # Keep enough grid steps for pipelining and for both v7x TensorCores.
    while tm > sub and -(-M // tm) < 8:
        tm //= 2
    return max(tm, sub)


def layer_norm(x, alpha, beta, *, eps=1e-6, tm=None):
    """Applies the custom LayerNorm over the last axis of x."""
    orig_shape = x.shape
    H = x.shape[-1]
    assert H > 1, "LayerNorm over a size-1 last axis divides by zero (n-1)."
    xr = x.reshape(-1, H)
    M = xr.shape[0]
    itemsize = jnp.dtype(x.dtype).itemsize

    if tm is None:
        tm = _choose_tm(M, H, itemsize)

    grid_m = pl.cdiv(M, tm)
    m_pad = grid_m * tm
    if m_pad != M:
        # Pad rows so tm can be chosen for performance, not divisibility.
        # Padded rows are all-zero -> finite output (= beta); sliced off below.
        xr = jnp.pad(xr, ((0, m_pad - M), (0, 0)))

    # Double-buffered input + output tiles, plus headroom for compiler scratch.
    tile_bytes = 4 * tm * H * itemsize
    vmem_limit = min(48 * 1024 * 1024,
                     max(tile_bytes + 8 * 1024 * 1024, 32 * 1024 * 1024))

    out = pl.pallas_call(
        functools.partial(_layernorm_kernel, eps=eps),
        out_shape=jax.ShapeDtypeStruct((m_pad, H), x.dtype),
        grid=(grid_m,),
        in_specs=[
            pl.BlockSpec(memory_space=pltpu.MemorySpace.SMEM),  # alpha (1,)
            pl.BlockSpec(memory_space=pltpu.MemorySpace.SMEM),  # beta  (1,)
            pl.BlockSpec((tm, H), lambda i: (i, 0)),            # x row tile
        ],
        out_specs=pl.BlockSpec((tm, H), lambda i: (i, 0)),
        compiler_params=pltpu.CompilerParams(
            dimension_semantics=("parallel",),
            vmem_limit_bytes=vmem_limit,
        ),
    )(alpha, beta, xr)

    if m_pad != M:
        out = out[:M]
    return out.reshape(orig_shape)


def _reference(x, alpha, beta, eps=1e-6):
    mu = jnp.mean(x, axis=-1, keepdims=True)
    # Unbiased std, like torch.std.
    var = jnp.sum((x - mu) ** 2, axis=-1, keepdims=True) / (x.shape[-1] - 1)
    std = jnp.sqrt(var)
    return alpha[0] * (x - mu) / (std + eps) + beta[0]


if __name__ == "__main__":
    key = jax.random.PRNGKey(0)
    batch, seq, hidden = 2, 8, 32
    x = jax.random.normal(key, (batch, seq, hidden), dtype=jnp.float32)

    # Deterministic parameter init, matching nn.Parameter(torch.ones(1)/zeros(1)).
    alpha = jnp.ones((1,), dtype=jnp.float32)
    beta = jnp.zeros((1,), dtype=jnp.float32)

    y = layer_norm(x, alpha, beta, eps=1e-6)
    y = jax.block_until_ready(y)

    y_ref = _reference(x, alpha, beta, eps=1e-6)
    assert y.shape == x.shape and y.dtype == x.dtype
    assert jnp.allclose(y, y_ref, atol=1e-5, rtol=1e-5), "mismatch vs reference"

    # Also exercise a non-divisible row count to verify the cdiv/pad path.
    x2 = jax.random.normal(jax.random.PRNGKey(1), (3, 7, hidden), jnp.float32)
    y2 = jax.block_until_ready(layer_norm(x2, alpha, beta, eps=1e-6))
    assert jnp.allclose(y2, _reference(x2, alpha, beta, 1e-6), atol=1e-5, rtol=1e-5)

    print("KERNEL_OK")
</pallas_src>

<mosaic_0001>
module attributes {stable_mosaic.version = 11 : i64} {
  func.func @_layernorm_kernel(%arg0: i32, %arg1: memref<1xf32, #tpu.memory_space<smem>>, %arg2: memref<1xf32, #tpu.memory_space<smem>>, %arg3: memref<8x32xf32, #tpu.memory_space<vmem>>, %arg4: memref<8x32xf32, #tpu.memory_space<vmem>>) attributes {dimension_semantics = [#tpu.dimension_semantics<parallel>], iteration_bounds = array<i64: 2>, scalar_prefetch = 0 : i64, scratch_operands = 0 : i64, tpu.core_type = #tpu.core_type<tc>, window_params = [{transform_indices = @transform_0, window_bounds = array<i64: 1>}, {transform_indices = @transform_1, window_bounds = array<i64: 1>}, {transform_indices = @transform_2, window_bounds = array<i64: 8, 32>}, {transform_indices = @transform_3, window_bounds = array<i64: 8, 32>}]} {
    %c0 = arith.constant 0 : index
    %c0_0 = arith.constant 0 : index
    %0 = vector.load %arg3[%c0, %c0_0] : memref<8x32xf32, #tpu.memory_space<vmem>>, vector<8x32xf32>
    %cst = arith.constant dense<0.000000e+00> : vector<8xf32>
    %1 = vector.multi_reduction <add>, %0, %cst [1] : vector<8x32xf32> to vector<8xf32>
    %2 = vector.shape_cast %1 : vector<8xf32> to vector<8x1xf32>
    %cst_1 = arith.constant 3.200000e+01 : f32
    %3 = vector.broadcast %cst_1 : f32 to vector<8x1xf32>
    %4 = arith.divf %2, %3 : vector<8x1xf32>
    %5 = vector.broadcast %4 : vector<8x1xf32> to vector<8x32xf32>
    %6 = arith.subf %0, %5 : vector<8x32xf32>
    %7 = arith.mulf %6, %6 : vector<8x32xf32>
    %cst_2 = arith.constant dense<0.000000e+00> : vector<8xf32>
    %8 = vector.multi_reduction <add>, %7, %cst_2 [1] : vector<8x32xf32> to vector<8xf32>
    %9 = vector.shape_cast %8 : vector<8xf32> to vector<8x1xf32>
    %cst_3 = arith.constant 0.0322580636 : f32
    %10 = vector.broadcast %cst_3 : f32 to vector<8x1xf32>
    %11 = arith.mulf %9, %10 : vector<8x1xf32>
    %12 = math.sqrt %11 : vector<8x1xf32>
    %cst_4 = arith.constant 9.99999997E-7 : f32
    %13 = vector.broadcast %cst_4 : f32 to vector<8x1xf32>
    %14 = arith.addf %12, %13 : vector<8x1xf32>
    %15 = tpu.reciprocal %14 : vector<8x1xf32> -> vector<8x1xf32>
    %c0_5 = arith.constant 0 : index
    %16 = memref.load %arg1[%c0_5] : memref<1xf32, #tpu.memory_space<smem>>
    %c0_6 = arith.constant 0 : index
    %17 = memref.load %arg2[%c0_6] : memref<1xf32, #tpu.memory_space<smem>>
    %18 = vector.broadcast %16 : f32 to vector<8x1xf32>
    %19 = arith.mulf %18, %15 : vector<8x1xf32>
    %20 = vector.broadcast %19 : vector<8x1xf32> to vector<8x32xf32>
    %21 = arith.mulf %6, %20 : vector<8x32xf32>
    %22 = vector.broadcast %17 : f32 to vector<8x32xf32>
    %23 = arith.addf %21, %22 : vector<8x32xf32>
    %c0_7 = arith.constant 0 : index
    %c0_8 = arith.constant 0 : index
    %24 = vector.load %arg4[%c0_7, %c0_8] : memref<8x32xf32, #tpu.memory_space<vmem>>, vector<8x32xf32>
    tpu.vector_store %arg4[%c0_7, %c0_8], %23 {strides = array<i32>} : memref<8x32xf32, #tpu.memory_space<vmem>>, vector<8x32xf32>,
    return
  }
  func.func @transform_0(%arg0: i32) -> i32 {
    %c0_i32 = arith.constant 0 : i32
    %c0_i32_0 = arith.constant 0 : i32
    return %c0_i32 : i32
  }
  func.func @transform_1(%arg0: i32) -> i32 {
    %c0_i32 = arith.constant 0 : i32
    %c0_i32_0 = arith.constant 0 : i32
    return %c0_i32 : i32
  }
  func.func @transform_2(%arg0: i32) -> (i32, i32) {
    %c0_i32 = arith.constant 0 : i32
    %c0_i32_0 = arith.constant 0 : i32
    return %arg0, %c0_i32 : i32, i32
  }
  func.func @transform_3(%arg0: i32) -> (i32, i32) {
    %c0_i32 = arith.constant 0 : i32
    %c0_i32_0 = arith.constant 0 : i32
    return %arg0, %c0_i32 : i32, i32
  }
}

</mosaic_0001>

<bundles_post_ra>
// kernel: tpu_custom_call.1
= control target key start
LH: loop header
LB: loop body
LE: loop exit
PB: predicated region body
PF: predicated region fallthrough
CT: control target
= control target key end

     0   :  { %s658_s0 = inlined_call_operand.<no memory space> [shape: f32[1], index: 0, kind: input, shape index: {}]   ;;  %s659_s1 = inlined_call_operand.<no memory space> [shape: f32[1], index: 1, kind: input, shape index: {}]   ;;  %s660_s2 = inlined_call_operand.hbm [shape: f32[16,32], index: 2, kind: input, shape index: {}]   ;;  %s661_s3 = inlined_call_operand.hbm [shape: f32[16,32], index: 3, kind: output, shape index: {}]  }
   0x1   :  { %8 = sst [smem:[#allocation2]] %s658_s0 }
   0x2   :  { %9 = sst [smem:[#allocation3]] %s659_s1 }
   0x3   :  { %10 = vsyncpa [#allocation5], 0 }
   0x4   :  { %12 = vsyncpa [#allocation5 + $0x1], 0 }
   0x5   :  { %13 = vsyncpa [#allocation6], 0 }
   0x6   :  { %15 = vsyncpa [#allocation6 + $0x1], 0  ;;  %s490_s16 = smov 0   ;;  %s492_s17 = smov 0  }
   0x7   :  { %s494_s18 = smov 0   ;;  %s496_s19 = smov 0  }
   0x8 LB: > { %s511_s0 = sadd.s32 4294967295, %s460_s19   ;;  %s302_s1 = sadd.s32 4294967294, %s460_s19   ;;  %s460_s19 = sphi %s496_s19, %s676_s19   ;;  %s456_s18 = sphi %s494_s18, %s675_s18   ;;  %s452_s17 = sphi %s492_s17, %s674_s17   ;;  %s448_s16 = sphi %s490_s16, %s673_s16  }
   0x9   : > { %s515_s20 = sadd.s32 1, %s460_s19   ;;  %s70_s21 = sadd.s32 1, %s456_s18 }
   0xa   : > { %s67_s22 = ssub.s32 %s460_s19, %s515_s20  ;;  %p77_p0 = scmp.ne.s32.totalorder %s456_s18, %s452_s17 }
   0xb   : > { %p68_p1 = scmp.eq.s32.totalorder %s67_s22, 0  ;;  %p78_p2 = scmp.eq.s32.totalorder %s460_s19, 0 }
   0xc   : > { %p83_p3 = scmp.ne.s32.totalorder %s452_s17, %s448_s16  ;;  %p84_p4 = scmp.eq.s32.totalorder %s511_s0, 0 }
   0xd   : > { %s527_s23 = scalar_select %p68_p1, %s456_s18, %s70_s21  }
   0xe   : > { %p529_p5 = por %p78_p2, %p77_p0  ;;  %p533_p6 = por %p84_p4, %p83_p3 }
   0xf   : > { %p107_p7 = scmp.eq.s32.totalorder %s511_s0, 1  ;;  %p113_p8 = scmp.eq.s32.totalorder %s302_s1, 1 }
  0x10   : > { %p326_p10 = scmp.lt.s32.totalorder %s460_s19, 2  ;;  %s139_s28 = sand.u32 1, %s456_s18  }
  0x11   : > { %p540_p11 = por %p107_p7, %p77_p0  ;;  %p544_p12 = por %p113_p8, %p83_p3 }
  0x12   : > { %s306_s29 = sshll.u32 %s460_s19, 7  ;;  %s305_s30 = sshll.u32 %s139_s28, 3 }
  0x13   : > { %s665_s26 = scalar_select %p540_p11, 1, 0 }
  0x14   : > { %s666_s27 = scalar_select %p544_p12, 1, 0 }
  0x15   : > { %s553_s6 = scalar_lea.hbm %s660_s2, %s306_s29  ;;  %s143_s7 = scalar_lea.vmem [#allocation4], %s305_s30 }
  0x16   : > { %s150_s8 = sshll.u32 %s143_s7, 4  ;;  %p557_p13 = pnand %p326_p10, %p529_p5  ;;  %s561_s8 = int_to_ptr.vmem [resolvable:$true] %s150_s8 }
  0x17   : > { %s140_s10 = scalar_lea.sflag [#allocation5], %s139_s28  ;;  %s364_s11 = scalar_lea.hbm %s553_s6, 128 }
  0x18   : > { %p365_p2 = scmp.ne.s32.totalorder %s553_s6, %s364_s11  ;;  %p366_p3 = pneg %p557_p13 }
  0x19   : > { %s369_s14 = scalar_lea.hbm %s660_s2, 256  ;;  %p370_p5 = scmp.lt.u32.totalorder %s553_s6, %s660_s2 }
  0x1a   : > { %p367_p4 = pnand %p366_p3, %p365_p2  ;;  %p371_p8 = scmp.lt.u32.totalorder %s369_s14, %s364_s11 }
  0x1b   : > { %p373_p9 = scmp.lt.u32.totalorder %s364_s11, %s553_s6 }
  0x1c   : > { %p368_p7 = pneg %p367_p4  ;;  %p372_p10 = por %p371_p8, %p370_p5 }
  0x1e   : > { %p374_p0 = por %p373_p9, %p372_p10 }
  0x20   : > { %p375_p1 = pnand %p374_p0, %p368_p7 }
  0x22   : > { %378 = shalt.err (!%p375_p1)
}
  0x23   : > { %s379_s21 = scalar_lea.vmem %s561_s8, 128  ;;  %s462_s22 = smov [#allocation4]  }
  0x24   : > { %p380_p2 = scmp.ne.s32.totalorder %s561_s8, %s379_s21  ;;  %s384_s24 = sshll.u32 %s462_s22, 4  ;;  %s385_s24 = int_to_ptr.vmem [resolvable:$false] %s384_s24 }
  0x25   : > { %s386_s28 = scalar_lea.vmem %s385_s24, 256  ;;  %p387_p11 = scmp.lt.s32.totalorder %s561_s8, %s385_s24 }
  0x26   : > { %p382_p4 = pnand %p380_p2, %p366_p3  ;;  %p388_p5 = scmp.lt.s32.totalorder %s386_s28, %s379_s21 }
  0x28   : > { %p383_p12 = pneg %p382_p4  ;;  %p389_p8 = por %p388_p5, %p387_p11 }
  0x2a   : > { %p390_p9 = pnand %p389_p8, %p383_p12 }
  0x2c   : > { %393 = shalt.err (!%p390_p9)
}
  0x2d   : > { %321 = dma.hbm_to_vmem [thread:$0]  (!%p557_p13), %s553_s6, 128, %s561_s8, %s140_s10  }
  0x2e   : > { %p668_p0 = scmp.lt.s32.totalorder %s460_s19, 3  ;;  %p669_p1 = scmp.ge.s32.totalorder %s460_s19, 1 }
  0x30   : > { %p156_p3 = pnand %p669_p1, %p668_p0 }
  0x31   : > { %s595_s29 = sand.u32 (!%p156_p3), 1, %s452_s17  }
  0x32   : > { %159 = sbr.rel (%p156_p3) target bundleno = 401 (0x191), region = 32  ;;  %s308_s30 = sshll.u32 (!%p156_p3), %s595_s29, 3 }
  0x33   : > { %s162_s4 = scalar_lea.sflag (!%p156_p3), [#allocation5], %s595_s29  ;;  %s165_s5 = scalar_lea.vmem (!%p156_p3), [#allocation4], %s308_s30 }
  0x39   : > { %439 = dma.done.wait (%p533_p6), %s162_s4, 128  }
  0x3a   : > { %441 = vsyncadd (%p533_p6), %s162_s4, 4294967168  ;;  %vm189_vm0 = vcmask 261120   ;;  %v188_v0 = vld [vmem:[%s165_s5] sm:$0xff]  ;;  %s210_s25 = sld [smem:[#allocation2]]  ;;  %s311_s7 = sshll.u32 %s511_s0, 7 }
  0x3b   : > { %v190_v1 = vsel %vm189_vm0, %v188_v0, 0.0  ;;  %s211_s6 = sld [smem:[#allocation3]]  ;;  %s187_s8 = scalar_lea.vmem [#allocation7], %s308_s30 }
  0x3c   : > { %191 = vadd.xlane.f32.xlu0 %v190_v1  ;;  %s232_s9 = sshll.u32 %s187_s8, 4  ;;  %s613_s12 = scalar_lea.hbm %s661_s3, %s311_s7  ;;  %s615_s9 = int_to_ptr.vmem [resolvable:$true] %s232_s9 }
  0x3d   : > { %s219_s13 = scalar_lea.sflag [#allocation6], %s595_s29  ;;  %s394_s14 = scalar_lea.vmem %s615_s9, 128 }
  0x3e   : > { %p395_p6 = scmp.ne.s32.totalorder %s615_s9, %s394_s14  ;;  %p670_p11 = scmp.ne.s32.totalorder %s665_s26, 0 }
  0x3f   : > { %s463_s0 = smov [#allocation7]  }
  0x40   : > { %v212_v15 = vstv %s210_s25  ;;  %p396_p12 = pnand %p395_p6, %p670_p11  ;;  %s398_s15 = sshll.u32 %s463_s0, 4  ;;  %s399_s15 = int_to_ptr.vmem [resolvable:$false] %s398_s15 }
  0x41   : > { %v215_v18 = vstv %s211_s6  ;;  %s400_s1 = scalar_lea.vmem %s399_s15, 256  ;;  %p401_p7 = scmp.lt.s32.totalorder %s615_s9, %s399_s15 }
  0x42   : > { %p397_p13 = pneg %p396_p12  ;;  %p402_p10 = scmp.lt.s32.totalorder %s400_s1, %s394_s14 }
  0x44   : > { %p403_p2 = por %p402_p10, %p401_p7 }
  0x46   : > { %p404_p4 = pnand %p403_p2, %p397_p13 }
  0xc9   : > { %v192_v2 = vpop.xlane.xlu0 %191 }
  0xca   : > { %v194_v3 = vmul.f32 0.03125, %v192_v2 }
  0xcc   : > { %v195_v4 = vsub.f32 %v188_v0, %v194_v3 }
  0xce   : > { %v196_v5 = vmul.f32 %v195_v4, %v195_v4 }
  0xd0   : > { %v197_v6 = vsel %vm189_vm0, %v196_v5, 0.0 }
  0xd1   : > { %198 = vadd.xlane.f32.xlu0 %v197_v6 }
 0x15e   : > { %v199_v7 = vpop.xlane.xlu0 %198 }
 0x15f   : > { %v200_v8 = vmul.f32 0.032258064, %v199_v7 }
 0x161   : > { %360 = vrsqrt.f32 %v200_v8  ;;  %vm203_vm1 = vcmp.eq.f32.partialorder %v200_v8, inf  ;;  %v206_v11 = vand.u32 2147483648, %v200_v8  ;;  %vm205_vm2 = vcmp.eq.f32.partialorder %v200_v8, 0.0 }
 0x16b   : > { %v361_v9 = vpop.eup %360 }
 0x16c   : > { %v202_v10 = vmul.f32 %v361_v9, %v200_v8 }
 0x16e   : > { %v204_v12 = vsel %vm203_vm1, %v200_v8, %v202_v10 }
 0x16f   : > { %v207_v13 = vsel %vm205_vm2, %v206_v11, %v204_v12 }
 0x170   : > { %v208_v14 = vadd.f32 1e-06, %v207_v13 }
 0x172   : > { %362 = vrcp.f32 %v208_v14 }
 0x17c   : > { %v363_v16 = vpop.eup %362 }
 0x17d   : > { %v213_v17 = vmul.f32 %v363_v16, %v212_v15 }
 0x17f   : > { %v214_v19 = vmul.f32 %v213_v17, %v195_v4 }
 0x181   : > { %v216_v20 = vadd.f32 %v215_v18, %v214_v19 }
 0x183   : > { %217 = vst.msk [vmem:[%s187_s8] sm:$0xff] %vm189_vm0, %v216_v20 }
 0x184   : > { %407 = shalt.err (!%p404_p4)
}
 0x185   : > { %s408_s21 = scalar_lea.hbm %s613_s12, 128  ;;  %s412_s28 = scalar_lea.hbm %s661_s3, 256 }
 0x186   : > { %p409_p5 = scmp.ne.s32.totalorder %s613_s12, %s408_s21  ;;  %p413_p0 = scmp.lt.u32.totalorder %s613_s12, %s661_s3 }
 0x187   : > { %p414_p1 = scmp.lt.u32.totalorder %s412_s28, %s408_s21  ;;  %p416_p6 = scmp.lt.u32.totalorder %s408_s21, %s613_s12 }
 0x188   : > { %p410_p8 = pnand %p409_p5, %p670_p11 }
 0x189   : > { %p415_p3 = por %p414_p1, %p413_p0 }
 0x18a   : > { %p411_p9 = pneg %p410_p8 }
 0x18b   : > { %p417_p12 = por %p416_p6, %p415_p3 }
 0x18d   : > { %p418_p13 = pnand %p417_p12, %p411_p9 }
 0x18f   : > { %421 = shalt.err (!%p418_p13)
}
 0x190   : > { %316 = dma.vmem_to_hbm [thread:$0]  (%p670_p11), %s615_s9, 128, %s613_s12, %s219_s13  }
 0x191 PF: > { %s244_s4 = sand.u32 1, %s448_s16   ;;  %p671_p7 = scmp.ne.s32.totalorder %s666_s27, 0 }
 0x192   : > { %p672_p10 = scmp.ge.s32.totalorder %s460_s19, 2  ;;  %s245_s5 = scalar_lea.sflag [#allocation6], %s244_s4 }
 0x194   : > { %p323_p2 = pnand %p672_p10, %p671_p7 }
 0x196   : > { %443 = dma.done.wait (!%p323_p2), %s245_s5, 128  }
 0x197   : > { %445 = vsyncadd (!%p323_p2), %s245_s5, 4294967168  ;;  %p18_p4 = scmp.ge.s32.totalorder %s515_s20, 4   ;;  %s673_s16 = smov %s452_s17 }
 0x198   : > { %s674_s17 = smov %s456_s18  ;;  %s675_s18 = smov %s527_s23 }
 0x199   : > { %s676_s19 = smov %s515_s20  ;;  %20 = sbr.rel (!%p18_p4) target bundleno = 8 (0x8), region = 77 }
 0x1a0   :  { %250 = vsyncpa [#allocation5], 1 }
 0x1a1   :  { %252 = vsyncpa [#allocation5 + $0x1], 1 }
 0x1a2   :  { %253 = vsyncpa [#allocation6], 1 }
 0x1a3   :  { %255 = vsyncpa [#allocation6 + $0x1], 1 }

</bundles_post_ra>
